<compile_context>
chip_gen: v7x
topology: tpu7x:2x2x1
jax: 0.10.0
libtpu: 0.0.40
codegen_flags: <defaults>
</compile_context>

<pallas_src>
import functools

import jax
import jax.numpy as jnp
from jax.experimental import pallas as pl
from jax.experimental.pallas import tpu as pltpu

NUM_CLASSES = 8
GAMMA = 2.0          # == 2.0 -> explicit square in the kernel
ALPHA = 0.25
LOSS_CLS_W = 1.0
LOSS_REG_W = 1.0
LOSS_CTN_W = 1.0
EPS = 1e-14

LANE = 128
MAX_LANE_TILE = 8192   # anchors per grid step: ~0.6 MiB payload + ~0.16 MiB flags


def _rcp(x):
    # approx reciprocal (EUP) + one Newton step -> ~f32 accuracy, no full divide.
    r = pl.reciprocal(x, approx=True)
    return r * (2.0 - x * r)


def criterion_kernel(payload_ref, flags_ref, out_ref, *, num_classes):
    """Grid = (B, num_hw_tiles), both axes parallel.  Each step writes raw partial
    sums (cls, reg, ctn, num_pos, num_pos_cls) for its (sample, anchor-chunk) into
    its own lane-dense (8, 128) output block; normalization happens in the wrapper."""
    C = num_classes

    pay = payload_ref[0]                        # (2C+2, T)  f32, lane-dense
    flg = flags_ref[0].astype(jnp.float32)      # (C+2, T)   bf16 -> f32

    logits = pay[0:C]                           # (C, T)
    pb = pay[C:C + 4]                           # (4, T) pred box
    tb = pay[C + 4:C + 8]                       # (4, T) gt box
    ctn_x = pay[C + 8:C + 9]                    # (1, T) ctn logit
    t_ctn = pay[C + 9:C + 10]                   # (1, T) ctn target

    t_lab = flg[0:C]                            # (C, T) one-hot labels
    pos = flg[C:C + 1]                          # (1, T) positive flag
    mask = flg[C + 1:C + 2]                     # (1, T) valid-anchor mask

    # ---------------- classification: focal loss (sigmoid fused into the BCE) --------
    e = jnp.exp(-jnp.abs(logits))                       # single EUP exp per element
    ce = jnp.maximum(logits, 0.0) - logits * t_lab + jnp.log1p(e)
    inv1pe = _rcp(1.0 + e)
    sig = jnp.where(logits >= 0.0, inv1pe, e * inv1pe)  # == sigmoid(logits)
    w = jnp.abs(t_lab - sig)                            # == 1 - p_t for binary targets
    alpha_t = ALPHA * t_lab + (1.0 - ALPHA) * (1.0 - t_lab)
    focal = alpha_t * (ce * (w * w)) * mask             # GAMMA == 2 -> square
    cls_sum = jnp.sum(focal)
    npos_cls = jnp.sum((t_lab == 1.0).astype(jnp.float32))

    # ---------------- regression: (1 - GIoU) on positive anchors ---------------------
    px1, py1, px2, py2 = pb[0:1], pb[1:2], pb[2:3], pb[3:4]
    tx1, ty1, tx2, ty2 = tb[0:1], tb[1:2], tb[2:3], tb[3:4]
    ix1 = jnp.maximum(px1, tx1)
    iy1 = jnp.maximum(py1, ty1)
    ix2 = jnp.minimum(px2, tx2)
    iy2 = jnp.minimum(py2, ty2)
    area_p = (px2 - px1) * (py2 - py1)
    area_t = (tx2 - tx1) * (ty2 - ty1)
    en = ((ix1 < ix2) & (iy1 < iy2)).astype(jnp.float32)
    area_i = (ix2 - ix1) * (iy2 - iy1) * en
    area_u = area_p + area_t - area_i
    iou = area_i * _rcp(area_u + EPS)
    cx1 = jnp.minimum(px1, tx1)
    cy1 = jnp.minimum(py1, ty1)
    cx2 = jnp.maximum(px2, tx2)
    cy2 = jnp.maximum(py2, ty2)
    area_c = (cx2 - cx1) * (cy2 - cy1)
    giou = iou - (area_c - area_u) * _rcp(area_c + EPS)
    reg_sum = jnp.sum((1.0 - giou) * mask * pos)

    # ---------------- centerness: BCE-with-logits on positive anchors ----------------
    e2 = jnp.exp(-jnp.abs(ctn_x))
    bce = jnp.maximum(ctn_x, 0.0) - ctn_x * t_ctn + jnp.log1p(e2)
    ctn_sum = jnp.sum(bce * mask * pos)

    npos = jnp.sum(pos)

    # Write the 5 partial sums to rows 0..4 (broadcast across all 128 lanes;
    # the wrapper reads lane 0).  Lane-dense, unmasked stores.
    ridx = jax.lax.broadcasted_iota(jnp.int32, (8, 128), 0)
    out_ref[0, 0] = (jnp.where(ridx == 0, cls_sum, 0.0)
                     + jnp.where(ridx == 1, reg_sum, 0.0)
                     + jnp.where(ridx == 2, ctn_sum, 0.0)
                     + jnp.where(ridx == 3, npos, 0.0)
                     + jnp.where(ridx == 4, npos_cls, 0.0))


def _pack_inputs(pred_cls, pred_box, pred_ctn, targets, masks, hw_padded):
    """Repack channel-first into a f32 payload [B, 2C+2, HWp] and a bf16 flags tensor
    [B, C+2, HWp] (anchors on the 128-lane axis)."""
    B, HW, C = pred_cls.shape

    payload = jnp.concatenate([
        pred_cls.astype(jnp.float32),            # rows [0, C)
        pred_box.astype(jnp.float32),            # rows [C, C+4)
        targets[..., C:C + 4].astype(jnp.float32),   # rows [C+4, C+8)  gt box
        pred_ctn.astype(jnp.float32),            # row C+8
        targets[..., -2:-1].astype(jnp.float32),     # row C+9   centerness target
    ], axis=-1)                                  # (B, HW, 2C+2)

    flags = jnp.concatenate([
        targets[..., :C].astype(jnp.bfloat16),   # rows [0, C)  one-hot labels
        targets[..., -1:].astype(jnp.bfloat16),  # row C        pos flag
        masks[..., None].astype(jnp.bfloat16),   # row C+1      valid mask
    ], axis=-1)                                  # (B, HW, C+2)

    pad = hw_padded - HW
    if pad:
        payload = jnp.pad(payload, ((0, 0), (0, pad), (0, 0)))
        flags = jnp.pad(flags, ((0, 0), (0, pad), (0, 0)))

    return jnp.swapaxes(payload, 1, 2), jnp.swapaxes(flags, 1, 2)


def criterion_pallas(pred_cls, pred_box, pred_ctn, targets, masks):
    B, HW, C = pred_cls.shape
    assert C == NUM_CLASSES

    pay_rows = 2 * C + 2        # 18 for C = 8 (full-extent sublane dim, no pad rows)
    flag_rows = C + 2           # 10

    # HW tiling: lane-dense tiles of up to MAX_LANE_TILE anchors; tile chosen so the
    # total pad is < 128 * num_t (keeps waste ~1% even for very large HW).
    hw128 = ((HW + LANE - 1) // LANE) * LANE
    num_t = -(-hw128 // MAX_LANE_TILE)
    tile = ((-(-hw128 // num_t) + LANE - 1) // LANE) * LANE
    hw_padded = tile * num_t

    payload, flags = _pack_inputs(pred_cls, pred_box, pred_ctn, targets, masks,
                                  hw_padded)

    out = pl.pallas_call(
        functools.partial(criterion_kernel, num_classes=C),
        out_shape=jax.ShapeDtypeStruct((B, num_t, 8, 128), jnp.float32),
        grid=(B, num_t),
        in_specs=[
            pl.BlockSpec((1, pay_rows, tile), lambda b, t: (b, 0, t)),
            pl.BlockSpec((1, flag_rows, tile), lambda b, t: (b, 0, t)),
        ],
        out_specs=pl.BlockSpec((1, 1, 8, 128), lambda b, t: (b, t, 0, 0)),
        compiler_params=pltpu.CompilerParams(
            dimension_semantics=("parallel", "parallel"),
            vmem_limit_bytes=32 * 1024 * 1024),
    )(payload, flags)

    # Tiny reduction + normalization in the wrapper (per-sample clamp(num_pos, 1)).
    sums = out[:, :, :, 0].sum(axis=1)          # (B, 8): rows 0..4 hold partial sums
    npos = jnp.maximum(sums[:, 3], 1.0)
    npos_cls = jnp.maximum(sums[:, 4], 1.0)
    loss_labels = jnp.sum(sums[:, 0] / npos_cls) / B
    loss_bboxes = jnp.sum(sums[:, 1] / npos) / B
    loss_centerness = jnp.sum(sums[:, 2] / npos) / B
    total = (LOSS_CLS_W * loss_labels
             + LOSS_REG_W * loss_bboxes
             + LOSS_CTN_W * loss_centerness)
    return loss_labels, loss_bboxes, loss_centerness, total


# ------------------------- pure-JAX reference (for validation) -------------------------
def _bce_with_logits(x, t):
    return jnp.maximum(x, 0.0) - x * t + jnp.log1p(jnp.exp(-jnp.abs(x)))


def criterion_ref(pred_cls, pred_box, pred_ctn, targets, masks):
    C = NUM_CLASSES
    B = pred_cls.shape[0]
    m = masks.astype(jnp.float32)

    # focal loss
    t_lab = targets[..., :C]
    p = jax.nn.sigmoid(pred_cls)
    ce = _bce_with_logits(pred_cls, t_lab)
    p_t = p * t_lab + (1.0 - p) * (1.0 - t_lab)
    loss = ce * (1.0 - p_t) ** GAMMA
    loss = loss * m[..., None]
    alpha_t = ALPHA * t_lab + (1.0 - ALPHA) * (1.0 - t_lab)
    loss = alpha_t * loss
    num_pos_cls = jnp.maximum((t_lab == 1.0).astype(jnp.float32).sum((1, 2)), 1.0)
    loss_labels = (loss.sum((1, 2)) / num_pos_cls).sum() / B

    # giou
    tb = targets[..., C:C + 4]
    pos = targets[..., -1]
    num_pos = jnp.maximum(pos.sum(-1), 1.0)
    ix1 = jnp.maximum(pred_box[..., 0], tb[..., 0])
    iy1 = jnp.maximum(pred_box[..., 1], tb[..., 1])
    ix2 = jnp.minimum(pred_box[..., 2], tb[..., 2])
    iy2 = jnp.minimum(pred_box[..., 3], tb[..., 3])
    area_p = (pred_box[..., 2] - pred_box[..., 0]) * (pred_box[..., 3] - pred_box[..., 1])
    area_t = (tb[..., 2] - tb[..., 0]) * (tb[..., 3] - tb[..., 1])
    en = ((ix1 < ix2) & (iy1 < iy2)).astype(jnp.float32)
    area_i = (ix2 - ix1) * (iy2 - iy1) * en
    area_u = area_p + area_t - area_i
    iou = area_i / (area_u + EPS)
    cx1 = jnp.minimum(pred_box[..., 0], tb[..., 0])
    cy1 = jnp.minimum(pred_box[..., 1], tb[..., 1])
    cx2 = jnp.maximum(pred_box[..., 2], tb[..., 2])
    cy2 = jnp.maximum(pred_box[..., 3], tb[..., 3])
    area_c = (cx2 - cx1) * (cy2 - cy1)
    giou = iou - (area_c - area_u) / (area_c + EPS)
    loss_reg = (1.0 - giou) * m
    loss_bboxes = ((loss_reg * pos).sum(-1) / num_pos).sum() / B

    # centerness
    t_ctn = targets[..., -2]
    loss_ctn = _bce_with_logits(pred_ctn[..., 0], t_ctn) * m
    loss_centerness = ((loss_ctn * pos).sum(-1) / num_pos).sum() / B

    total = (LOSS_CLS_W * loss_labels + LOSS_REG_W * loss_bboxes
             + LOSS_CTN_W * loss_centerness)
    return loss_labels, loss_bboxes, loss_centerness, total


def _rand_boxes(key, shape_prefix):
    k1, k2 = jax.random.split(key)
    xy1 = jax.random.uniform(k1, shape_prefix + (2,), minval=0.0, maxval=10.0)
    wh = jax.random.uniform(k2, shape_prefix + (2,), minval=1.0, maxval=6.0)
    return jnp.concatenate([xy1, xy1 + wh], axis=-1)


if __name__ == "__main__":
    key = jax.random.PRNGKey(0)
    B, H, W, C = 2, 8, 8, NUM_CLASSES
    HW = H * W

    k = jax.random.split(key, 8)
    pred_cls = jax.random.normal(k[0], (B, HW, C), jnp.float32)
    pred_box = _rand_boxes(k[1], (B, HW))
    pred_ctn = jax.random.normal(k[2], (B, HW, 1), jnp.float32)

    # dense targets: [one-hot labels | gt box | centerness | pos-flag]
    pos = (jax.random.uniform(k[3], (B, HW)) < 0.2).astype(jnp.float32)
    cls_idx = jax.random.randint(k[4], (B, HW), 0, C)
    labels = jax.nn.one_hot(cls_idx, C, dtype=jnp.float32) * pos[..., None]
    gt_box = _rand_boxes(k[5], (B, HW))
    ctn = jax.random.uniform(k[6], (B, HW, 1), minval=0.0, maxval=1.0)
    targets = jnp.concatenate([labels, gt_box, ctn, pos[..., None]], axis=-1)

    masks = (jax.random.uniform(k[7], (B, HW)) < 0.9).astype(jnp.float32)

    out = criterion_pallas(pred_cls, pred_box, pred_ctn, targets, masks)
    out = jax.block_until_ready(out)

    ref = criterion_ref(pred_cls, pred_box, pred_ctn, targets, masks)
    for a, b in zip(out, ref):
        assert jnp.allclose(a, b, rtol=1e-3, atol=1e-3), (a, b)

    print("KERNEL_OK")
</pallas_src>

<mosaic_0001>
module attributes {stable_mosaic.version = 11 : i64} {
  func.func @criterion_kernel(%arg0: i32, %arg1: i32, %arg2: memref<1x18x128xf32, #tpu.memory_space<vmem>>, %arg3: memref<1x10x128xbf16, #tpu.memory_space<vmem>>, %arg4: memref<1x1x8x128xf32, #tpu.memory_space<vmem>>) attributes {dimension_semantics = [#tpu.dimension_semantics<parallel>, #tpu.dimension_semantics<parallel>], iteration_bounds = array<i64: 2, 1>, scalar_prefetch = 0 : i64, scratch_operands = 0 : i64, tpu.core_type = #tpu.core_type<tc>, window_params = [{transform_indices = @transform_0, window_bounds = array<i64: 1, 18, 128>}, {transform_indices = @transform_1, window_bounds = array<i64: 1, 10, 128>}, {transform_indices = @transform_2, window_bounds = array<i64: 1, 1, 8, 128>}]} {
    %c0 = arith.constant 0 : index
    %c0_0 = arith.constant 0 : index
    %c0_1 = arith.constant 0 : index
    %0 = vector.load %arg2[%c0, %c0_0, %c0_1] : memref<1x18x128xf32, #tpu.memory_space<vmem>>, vector<1x18x128xf32>
    %1 = vector.shape_cast %0 : vector<1x18x128xf32> to vector<18x128xf32>
    %c0_2 = arith.constant 0 : index
    %c0_3 = arith.constant 0 : index
    %c0_4 = arith.constant 0 : index
    %2 = vector.load %arg3[%c0_2, %c0_3, %c0_4] : memref<1x10x128xbf16, #tpu.memory_space<vmem>>, vector<1x10x128xbf16>
    %3 = vector.shape_cast %2 : vector<1x10x128xbf16> to vector<10x128xbf16>
    %4 = arith.extf %3 : vector<10x128xbf16> to vector<10x128xf32>
    %5 = vector.extract_strided_slice %1 {offsets = [0, 0], sizes = [8, 128], strides = [1, 1]} : vector<18x128xf32> to vector<8x128xf32>
    %6 = vector.extract_strided_slice %1 {offsets = [8, 0], sizes = [4, 128], strides = [1, 1]} : vector<18x128xf32> to vector<4x128xf32>
    %7 = vector.extract_strided_slice %1 {offsets = [12, 0], sizes = [4, 128], strides = [1, 1]} : vector<18x128xf32> to vector<4x128xf32>
    %8 = vector.extract_strided_slice %1 {offsets = [16, 0], sizes = [1, 128], strides = [1, 1]} : vector<18x128xf32> to vector<1x128xf32>
    %9 = vector.extract_strided_slice %1 {offsets = [17, 0], sizes = [1, 128], strides = [1, 1]} : vector<18x128xf32> to vector<1x128xf32>
    %10 = vector.extract_strided_slice %4 {offsets = [0, 0], sizes = [8, 128], strides = [1, 1]} : vector<10x128xf32> to vector<8x128xf32>
    %11 = vector.extract_strided_slice %4 {offsets = [8, 0], sizes = [1, 128], strides = [1, 1]} : vector<10x128xf32> to vector<1x128xf32>
    %12 = vector.extract_strided_slice %4 {offsets = [9, 0], sizes = [1, 128], strides = [1, 1]} : vector<10x128xf32> to vector<1x128xf32>
    %13 = math.absf %5 : vector<8x128xf32>
    %cst = arith.constant 0.000000e+00 : f32
    %14 = vector.broadcast %cst : f32 to vector<8x128xf32>
    %15 = arith.subf %14, %13 : vector<8x128xf32>
    %16 = math.exp %15 : vector<8x128xf32>
    %cst_5 = arith.constant 0.000000e+00 : f32
    %17 = vector.broadcast %cst_5 : f32 to vector<8x128xf32>
    %18 = arith.maximumf %5, %17 : vector<8x128xf32>
    %19 = arith.mulf %5, %10 : vector<8x128xf32>
    %20 = arith.subf %18, %19 : vector<8x128xf32>
    %21 = math.log1p %16 : vector<8x128xf32>
    %22 = arith.addf %20, %21 : vector<8x128xf32>
    %cst_6 = arith.constant 1.000000e+00 : f32
    %23 = vector.broadcast %cst_6 : f32 to vector<8x128xf32>
    %24 = arith.addf %23, %16 : vector<8x128xf32>
    %25 = tpu.reciprocal %24 {approx = true} : vector<8x128xf32> -> vector<8x128xf32>
    %26 = arith.mulf %24, %25 : vector<8x128xf32>
    %cst_7 = arith.constant 2.000000e+00 : f32
    %27 = vector.broadcast %cst_7 : f32 to vector<8x128xf32>
    %28 = arith.subf %27, %26 : vector<8x128xf32>
    %29 = arith.mulf %25, %28 : vector<8x128xf32>
    %cst_8 = arith.constant 0.000000e+00 : f32
    %30 = vector.broadcast %cst_8 : f32 to vector<8x128xf32>
    %31 = arith.cmpf oge, %5, %30 : vector<8x128xf32>
    %32 = arith.mulf %16, %29 : vector<8x128xf32>
    %33 = arith.select %31, %29, %32 : vector<8x128xi1>, vector<8x128xf32>
    %34 = arith.subf %10, %33 : vector<8x128xf32>
    %35 = math.absf %34 : vector<8x128xf32>
    %cst_9 = arith.constant 2.500000e-01 : f32
    %36 = vector.broadcast %cst_9 : f32 to vector<8x128xf32>
    %37 = arith.mulf %36, %10 : vector<8x128xf32>
    %cst_10 = arith.constant 1.000000e+00 : f32
    %38 = vector.broadcast %cst_10 : f32 to vector<8x128xf32>
    %39 = arith.subf %38, %10 : vector<8x128xf32>
    %cst_11 = arith.constant 7.500000e-01 : f32
    %40 = vector.broadcast %cst_11 : f32 to vector<8x128xf32>
    %41 = arith.mulf %40, %39 : vector<8x128xf32>
    %42 = arith.addf %37, %41 : vector<8x128xf32>
    %43 = arith.mulf %35, %35 : vector<8x128xf32>
    %44 = arith.mulf %22, %43 : vector<8x128xf32>
    %45 = arith.mulf %42, %44 : vector<8x128xf32>
    %46 = vector.broadcast %12 : vector<1x128xf32> to vector<8x128xf32>
    %47 = arith.mulf %45, %46 : vector<8x128xf32>
    %48 = vector.shape_cast %47 : vector<8x128xf32> to vector<1x8x128xf32>
    %cst_12 = arith.constant dense<0.000000e+00> : vector<1xf32>
    %49 = vector.multi_reduction <add>, %48, %cst_12 [1, 2] : vector<1x8x128xf32> to vector<1xf32>
    %50 = vector.shape_cast %49 : vector<1xf32> to vector<1x1x1xf32>
    %51 = vector.extract %50[0, 0, 0] : f32 from vector<1x1x1xf32>
    %cst_13 = arith.constant 1.000000e+00 : f32
    %52 = vector.broadcast %cst_13 : f32 to vector<8x128xf32>
    %53 = arith.cmpf oeq, %10, %52 : vector<8x128xf32>
    %54 = arith.extui %53 : vector<8x128xi1> to vector<8x128xi32>
    %55 = arith.sitofp %54 : vector<8x128xi32> to vector<8x128xf32>
    %56 = vector.shape_cast %55 : vector<8x128xf32> to vector<1x8x128xf32>
    %cst_14 = arith.constant dense<0.000000e+00> : vector<1xf32>
    %57 = vector.multi_reduction <add>, %56, %cst_14 [1, 2] : vector<1x8x128xf32> to vector<1xf32>
    %58 = vector.shape_cast %57 : vector<1xf32> to vector<1x1x1xf32>
    %59 = vector.extract %58[0, 0, 0] : f32 from vector<1x1x1xf32>
    %60 = vector.extract_strided_slice %6 {offsets = [0, 0], sizes = [1, 128], strides = [1, 1]} : vector<4x128xf32> to vector<1x128xf32>
    %61 = vector.extract_strided_slice %6 {offsets = [1, 0], sizes = [1, 128], strides = [1, 1]} : vector<4x128xf32> to vector<1x128xf32>
    %62 = vector.extract_strided_slice %6 {offsets = [2, 0], sizes = [1, 128], strides = [1, 1]} : vector<4x128xf32> to vector<1x128xf32>
    %63 = vector.extract_strided_slice %6 {offsets = [3, 0], sizes = [1, 128], strides = [1, 1]} : vector<4x128xf32> to vector<1x128xf32>
    %64 = vector.extract_strided_slice %7 {offsets = [0, 0], sizes = [1, 128], strides = [1, 1]} : vector<4x128xf32> to vector<1x128xf32>
    %65 = vector.extract_strided_slice %7 {offsets = [1, 0], sizes = [1, 128], strides = [1, 1]} : vector<4x128xf32> to vector<1x128xf32>
    %66 = vector.extract_strided_slice %7 {offsets = [2, 0], sizes = [1, 128], strides = [1, 1]} : vector<4x128xf32> to vector<1x128xf32>
    %67 = vector.extract_strided_slice %7 {offsets = [3, 0], sizes = [1, 128], strides = [1, 1]} : vector<4x128xf32> to vector<1x128xf32>
    %68 = arith.maximumf %60, %64 : vector<1x128xf32>
    %69 = arith.maximumf %61, %65 : vector<1x128xf32>
    %70 = arith.minimumf %62, %66 : vector<1x128xf32>
    %71 = arith.minimumf %63, %67 : vector<1x128xf32>
    %72 = arith.subf %62, %60 : vector<1x128xf32>
    %73 = arith.subf %63, %61 : vector<1x128xf32>
    %74 = arith.mulf %72, %73 : vector<1x128xf32>
    %75 = arith.subf %66, %64 : vector<1x128xf32>
    %76 = arith.subf %67, %65 : vector<1x128xf32>
    %77 = arith.mulf %75, %76 : vector<1x128xf32>
    %78 = arith.cmpf olt, %68, %70 : vector<1x128xf32>
    %79 = arith.cmpf olt, %69, %71 : vector<1x128xf32>
    %80 = arith.andi %78, %79 : vector<1x128xi1>
    %81 = arith.extui %80 : vector<1x128xi1> to vector<1x128xi32>
    %82 = arith.sitofp %81 : vector<1x128xi32> to vector<1x128xf32>
    %83 = arith.subf %70, %68 : vector<1x128xf32>
    %84 = arith.subf %71, %69 : vector<1x128xf32>
    %85 = arith.mulf %83, %84 : vector<1x128xf32>
    %86 = arith.mulf %85, %82 : vector<1x128xf32>
    %87 = arith.addf %74, %77 : vector<1x128xf32>
    %88 = arith.subf %87, %86 : vector<1x128xf32>
    %cst_15 = arith.constant 9.99999982E-15 : f32
    %89 = vector.broadcast %cst_15 : f32 to vector<1x128xf32>
    %90 = arith.addf %88, %89 : vector<1x128xf32>
    %91 = tpu.reciprocal %90 {approx = true} : vector<1x128xf32> -> vector<1x128xf32>
    %92 = arith.mulf %90, %91 : vector<1x128xf32>
    %cst_16 = arith.constant 2.000000e+00 : f32
    %93 = vector.broadcast %cst_16 : f32 to vector<1x128xf32>
    %94 = arith.subf %93, %92 : vector<1x128xf32>
    %95 = arith.mulf %91, %94 : vector<1x128xf32>
    %96 = arith.mulf %86, %95 : vector<1x128xf32>
    %97 = arith.minimumf %60, %64 : vector<1x128xf32>
    %98 = arith.minimumf %61, %65 : vector<1x128xf32>
    %99 = arith.maximumf %62, %66 : vector<1x128xf32>
    %100 = arith.maximumf %63, %67 : vector<1x128xf32>
    %101 = arith.subf %99, %97 : vector<1x128xf32>
    %102 = arith.subf %100, %98 : vector<1x128xf32>
    %103 = arith.mulf %101, %102 : vector<1x128xf32>
    %104 = arith.subf %103, %88 : vector<1x128xf32>
    %cst_17 = arith.constant 9.99999982E-15 : f32
    %105 = vector.broadcast %cst_17 : f32 to vector<1x128xf32>
    %106 = arith.addf %103, %105 : vector<1x128xf32>
    %107 = tpu.reciprocal %106 {approx = true} : vector<1x128xf32> -> vector<1x128xf32>
    %108 = arith.mulf %106, %107 : vector<1x128xf32>
    %cst_18 = arith.constant 2.000000e+00 : f32
    %109 = vector.broadcast %cst_18 : f32 to vector<1x128xf32>
    %110 = arith.subf %109, %108 : vector<1x128xf32>
    %111 = arith.mulf %107, %110 : vector<1x128xf32>
    %112 = arith.mulf %104, %111 : vector<1x128xf32>
    %113 = arith.subf %96, %112 : vector<1x128xf32>
    %cst_19 = arith.constant 1.000000e+00 : f32
    %114 = vector.broadcast %cst_19 : f32 to vector<1x128xf32>
    %115 = arith.subf %114, %113 : vector<1x128xf32>
    %116 = arith.mulf %115, %12 : vector<1x128xf32>
    %117 = arith.mulf %116, %11 : vector<1x128xf32>
    %118 = vector.shape_cast %117 : vector<1x128xf32> to vector<1x1x128xf32>
    %cst_20 = arith.constant dense<0.000000e+00> : vector<1xf32>
    %119 = vector.multi_reduction <add>, %118, %cst_20 [1, 2] : vector<1x1x128xf32> to vector<1xf32>
    %120 = vector.shape_cast %119 : vector<1xf32> to vector<1x1x1xf32>
    %121 = vector.extract %120[0, 0, 0] : f32 from vector<1x1x1xf32>
    %122 = math.absf %8 : vector<1x128xf32>
    %cst_21 = arith.constant 0.000000e+00 : f32
    %123 = vector.broadcast %cst_21 : f32 to vector<1x128xf32>
    %124 = arith.subf %123, %122 : vector<1x128xf32>
    %125 = math.exp %124 : vector<1x128xf32>
    %cst_22 = arith.constant 0.000000e+00 : f32
    %126 = vector.broadcast %cst_22 : f32 to vector<1x128xf32>
    %127 = arith.maximumf %8, %126 : vector<1x128xf32>
    %128 = arith.mulf %8, %9 : vector<1x128xf32>
    %129 = arith.subf %127, %128 : vector<1x128xf32>
    %130 = math.log1p %125 : vector<1x128xf32>
    %131 = arith.addf %129, %130 : vector<1x128xf32>
    %132 = arith.mulf %131, %12 : vector<1x128xf32>
    %133 = arith.mulf %132, %11 : vector<1x128xf32>
    %134 = vector.shape_cast %133 : vector<1x128xf32> to vector<1x1x128xf32>
    %cst_23 = arith.constant dense<0.000000e+00> : vector<1xf32>
    %135 = vector.multi_reduction <add>, %134, %cst_23 [1, 2] : vector<1x1x128xf32> to vector<1xf32>
    %136 = vector.shape_cast %135 : vector<1xf32> to vector<1x1x1xf32>
    %137 = vector.extract %136[0, 0, 0] : f32 from vector<1x1x1xf32>
    %138 = vector.shape_cast %11 : vector<1x128xf32> to vector<1x1x128xf32>
    %cst_24 = arith.constant dense<0.000000e+00> : vector<1xf32>
    %139 = vector.multi_reduction <add>, %138, %cst_24 [1, 2] : vector<1x1x128xf32> to vector<1xf32>
    %140 = vector.shape_cast %139 : vector<1xf32> to vector<1x1x1xf32>
    %141 = vector.extract %140[0, 0, 0] : f32 from vector<1x1x1xf32>
    %142 = tpu.iota {dimensions = array<i32: 0>} : vector<8x128xi32>
    %c0_i32 = arith.constant 0 : i32
    %143 = vector.broadcast %c0_i32 : i32 to vector<8x128xi32>
    %144 = arith.cmpi eq, %142, %143 : vector<8x128xi32>
    %cst_25 = arith.constant 0.000000e+00 : f32
    %145 = vector.broadcast %51 : f32 to vector<8x128xf32>
    %146 = vector.broadcast %cst_25 : f32 to vector<8x128xf32>
    %147 = arith.select %144, %145, %146 : vector<8x128xi1>, vector<8x128xf32>
    %c1_i32 = arith.constant 1 : i32
    %148 = vector.broadcast %c1_i32 : i32 to vector<8x128xi32>
    %149 = arith.cmpi eq, %142, %148 : vector<8x128xi32>
    %cst_26 = arith.constant 0.000000e+00 : f32
    %150 = vector.broadcast %121 : f32 to vector<8x128xf32>
    %151 = vector.broadcast %cst_26 : f32 to vector<8x128xf32>
    %152 = arith.select %149, %150, %151 : vector<8x128xi1>, vector<8x128xf32>
    %153 = arith.addf %147, %152 : vector<8x128xf32>
    %c2_i32 = arith.constant 2 : i32
    %154 = vector.broadcast %c2_i32 : i32 to vector<8x128xi32>
    %155 = arith.cmpi eq, %142, %154 : vector<8x128xi32>
    %cst_27 = arith.constant 0.000000e+00 : f32
    %156 = vector.broadcast %137 : f32 to vector<8x128xf32>
    %157 = vector.broadcast %cst_27 : f32 to vector<8x128xf32>
    %158 = arith.select %155, %156, %157 : vector<8x128xi1>, vector<8x128xf32>
    %159 = arith.addf %153, %158 : vector<8x128xf32>
    %c3_i32 = arith.constant 3 : i32
    %160 = vector.broadcast %c3_i32 : i32 to vector<8x128xi32>
    %161 = arith.cmpi eq, %142, %160 : vector<8x128xi32>
    %cst_28 = arith.constant 0.000000e+00 : f32
    %162 = vector.broadcast %141 : f32 to vector<8x128xf32>
    %163 = vector.broadcast %cst_28 : f32 to vector<8x128xf32>
    %164 = arith.select %161, %162, %163 : vector<8x128xi1>, vector<8x128xf32>
    %165 = arith.addf %159, %164 : vector<8x128xf32>
    %c4_i32 = arith.constant 4 : i32
    %166 = vector.broadcast %c4_i32 : i32 to vector<8x128xi32>
    %167 = arith.cmpi eq, %142, %166 : vector<8x128xi32>
    %cst_29 = arith.constant 0.000000e+00 : f32
    %168 = vector.broadcast %59 : f32 to vector<8x128xf32>
    %169 = vector.broadcast %cst_29 : f32 to vector<8x128xf32>
    %170 = arith.select %167, %168, %169 : vector<8x128xi1>, vector<8x128xf32>
    %171 = arith.addf %165, %170 : vector<8x128xf32>
    %c0_30 = arith.constant 0 : index
    %c0_31 = arith.constant 0 : index
    %c0_32 = arith.constant 0 : index
    %c0_33 = arith.constant 0 : index
    %172 = vector.load %arg4[%c0_30, %c0_31, %c0_32, %c0_33] : memref<1x1x8x128xf32, #tpu.memory_space<vmem>>, vector<1x1x8x128xf32>
    %173 = vector.shape_cast %172 : vector<1x1x8x128xf32> to vector<8x128xf32>
    %174 = vector.shape_cast %171 : vector<8x128xf32> to vector<1x1x8x128xf32>
    tpu.vector_store %arg4[%c0_30, %c0_31, %c0_32, %c0_33], %174 {strides = array<i32>} : memref<1x1x8x128xf32, #tpu.memory_space<vmem>>, vector<1x1x8x128xf32>,
    return
  }
  func.func @transform_0(%arg0: i32, %arg1: i32) -> (i32, i32, i32) {
    %c0_i32 = arith.constant 0 : i32
    %c0_i32_0 = arith.constant 0 : i32
    return %arg0, %c0_i32, %arg1 : i32, i32, i32
  }
  func.func @transform_1(%arg0: i32, %arg1: i32) -> (i32, i32, i32) {
    %c0_i32 = arith.constant 0 : i32
    %c0_i32_0 = arith.constant 0 : i32
    return %arg0, %c0_i32, %arg1 : i32, i32, i32
  }
  func.func @transform_2(%arg0: i32, %arg1: i32) -> (i32, i32, i32, i32) {
    %c0_i32 = arith.constant 0 : i32
    %c0_i32_0 = arith.constant 0 : i32
    %c0_i32_1 = arith.constant 0 : i32
    return %arg0, %arg1, %c0_i32, %c0_i32_0 : i32, i32, i32, i32
  }
}

</mosaic_0001>

<bundles_post_ra>
// kernel: tpu_custom_call.1
= control target key start
LH: loop header
LB: loop body
LE: loop exit
PB: predicated region body
PF: predicated region fallthrough
CT: control target
= control target key end

     0   :  { %7 = vsyncpa [#allocation3], 0  ;;  %s886_s0 = inlined_call_operand.vmem [shape: f32[2,18,128], index: 0, kind: input, shape index: {}]   ;;  %s887_s1 = inlined_call_operand.vmem [shape: bf16[2,10,128], index: 1, kind: input, shape index: {}]   ;;  %s888_s2 = inlined_call_operand.hbm [shape: f32[2,1,8,128], index: 2, kind: output, shape index: {}]  }
   0x1   :  { %9 = vsyncpa [#allocation3 + $0x1], 0  ;;  %s716_s9 = smov 0   ;;  %s718_s10 = smov 0  }
   0x2   :  { %s720_s11 = smov 0   ;;  %s722_s12 = smov 0  }
   0x3   :  { %s724_s13 = smov 0   ;;  %s726_s14 = smov 0  }
   0x4 LB: > { %s520_s15 = sadd.s32 4294967295, %s696_s14   ;;  %s521_s16 = sadd.s32 4294967294, %s696_s14   ;;  %s696_s14 = sphi %s726_s14, %s15_s14   ;;  %s692_s13 = sphi %s724_s13, %s901_s13   ;;  %s688_s12 = sphi %s722_s12, %s900_s12   ;;  %s684_s11 = sphi %s720_s11, %s899_s11   ;;  %s680_s10 = sphi %s718_s10, %s898_s10   ;;  %s676_s9 = sphi %s716_s9, %s897_s9  }
   0x5   : > { %s27_s17 = sadd.s32 1, %s692_s13  ;;  %s92_s18 = sadd.s32 1, %s684_s11 }
   0x6   : > { %p29_p0 = scmp.ge.s32.totalorder %s27_s17, 2  ;;  %p102_p1 = scmp.ne.s32.totalorder %s684_s11, %s680_s10 }
   0x7   : > { %p103_p2 = scmp.eq.s32.totalorder %s520_s15, 1  ;;  %p108_p3 = scmp.ne.s32.totalorder %s680_s10, %s676_s9 }
   0x8   : > { %s903_s17 = smov (%p29_p0, %s27_s17), 0  ;;  %p109_p5 = scmp.eq.s32.totalorder %s521_s16, 1 }
   0x9   : > { %p756_p4 = por %p103_p2, %p102_p1  ;;  %s87_s20 = ssub.s32 %s692_s13, %s903_s17 }
   0xa   : > { %p524_p6 = scmp.ge.s32.totalorder %s696_s14, 1  ;;  %p90_p7 = scmp.eq.s32.totalorder %s87_s20, 0 }
   0xb   : > { %p763_p8 = por %p109_p5, %p108_p3  ;;  %p149_p9 = scmp.lt.s32.totalorder %s696_s14, 3 }
   0xc   : > { %s769_s22 = scalar_select %p90_p7, %s684_s11, %s92_s18  }
   0xd   : > { %p150_p10 = pnand %p524_p6, %p149_p9 }
   0xe   : > { %p182_p11 = scmp.lt.s32.totalorder (!%p150_p10), %s688_s12, 1  ;;  %v698_v7 = vmov (!%p150_p10), 0.0   ;;  %v699_v24 = vmov (!%p150_p10), 0   ;;  %vm336_vm7 = vcmask (!%p150_p10), 1040384   ;;  %s179_s4 = sand.u32 (!%p150_p10), 1, %s680_s10  }
   0xf   : > { %153 = sbr.rel (%p150_p10) target bundleno = 312 (0x138), region = 28  ;;  %s525_s8 = sshll.u32 (!%p150_p10), %s179_s4, 3 }
  0x10   : > { %s532_s18 = sshll.u32 (!%p150_p10), %s688_s12, 7  ;;  %s181_s20 = scalar_lea.vmem (!%p150_p10), [#allocation2], %s525_s8 }
  0x11   : > { %s837_s26 = scalar_lea.hbm (!%p150_p10), %s888_s2, %s532_s18  ;;  %s414_s27 = scalar_lea.sflag (!%p150_p10), [#allocation3], %s179_s4 }
  0x16   : > { %s183_s23 = scalar_select %p182_p11, %s688_s12, 1 }
  0x17   : > { %s700_s12 = smov [#allocation2]  }
  0x18   : > { %s535_s24 = sshll.u32 %s183_s23, 3  ;;  %s536_s25 = smul.u32 24, %s183_s23 }
  0x19   : > { %s776_s28 = scalar_lea.vmem %s887_s1, %s535_s24  ;;  %s428_s23 = sshll.u32 %s181_s20, 4  ;;  %s839_s23 = int_to_ptr.vmem [resolvable:$true] %s428_s23 }
  0x1a   : > { %v201_v0 = vld [vmem:[%s776_s28] sm:$0xf]  ;;  %s189_s3 = scalar_lea.vmem %s886_s0, %s536_s25  ;;  %v202_v56 = vld [vmem:[%s776_s28 + $0x4] sm:$0x1]  ;;  %s618_s28 = scalar_lea.vmem %s839_s23, 128 }
  0x1b   : > { %v782_v1 = vunpack.c.l.bf16 %v201_v0  ;;  %v199_v2 = vld [vmem:[%s189_s3 + $0x8] sm:$0xff]  ;;  %v784_v3 = vld [vmem:[%s189_s3] sm:$0xff]  ;;  %v788_v12 = vld [vmem:[%s189_s3 + $0x10] sm:$0x3]  ;;  %p619_p12 = scmp.ne.s32.totalorder %s839_s23, %s618_s28  ;;  %s622_s29 = sshll.u32 %s700_s12, 4  ;;  %s623_s29 = int_to_ptr.vmem [resolvable:$false] %s622_s29 }
  0x1c   : > { %v266_v4 = vrot.slane %v199_v2, 4  ;;  %v270_v5 = vrot.slane %v199_v2, 6  ;;  %v205_v6 = vand.u32 2147483647, %v784_v3  ;;  %v347_v19 = vand.u32 2147483647, %v788_v12  ;;  %p625_p1 = scmp.lt.s32.totalorder %s839_s23, %s623_s29 }
  0x1d   : > { %vm253_vm0 = vcmp.eq.f32.partialorder %v782_v1, 1.0  ;;  %v353_v49 = vrot.slane %v788_v12, 1  ;;  %v351_v54 = vmax.f32 %v788_v12, 0.0  ;;  %vm227_vm6 = vcmp.ge.f32.partialorder %v784_v3, 0.0  ;;  %p620_p13 = pnand %p619_p12, %p756_p4  ;;  %s624_s30 = scalar_lea.vmem %s623_s29, 256 }
  0x1e   : > { %v529_v8 = vsel %vm253_vm0, 1.0, %v698_v7  ;;  %v268_v9 = vmax.f32 %v199_v2, %v266_v4  ;;  %v269_v10 = vmin.f32 %v199_v2, %v266_v4  ;;  %v272_v11 = vsub.f32 %v199_v2, %v270_v5  ;;  %p626_p2 = scmp.lt.s32.totalorder %s624_s30, %s618_s28 }
  0x1f   : > { %256 = vadd.xlane.f32.xlu0 %v529_v8  ;;  %v206_v13 = vsub.f32 0.0, %v205_v6  ;;  %v348_v26 = vsub.f32 0.0, %v347_v19  ;;  %v355_v60 = vmul.f32 %v353_v49, %v788_v12  ;;  %v239_v6 = vlaneseq  ;;  %p621_p0 = pneg %p620_p13 }
  0x20   : > { %v274_v14 = vrot.slane %v272_v11, 1  ;;  %v278_v15 = vrot.slane %v269_v10, 2  ;;  %v288_v16 = vrot.slane %v268_v9, 6  ;;  %v310_v17 = vrot.slane %v269_v10, 6  ;;  %p627_p3 = por %p626_p2, %p625_p1 }
  0x21   : > { %v207_v18 = vmul.f32 1.442695, %v206_v13  ;;  %v349_v31 = vmul.f32 1.442695, %v348_v26  ;;  %v204_v8 = vunpack.c.l.bf16 %v202_v56  ;;  %v210_v12 = vmul.f32 %v782_v1, %v784_v3 }
  0x22   : > { %v276_v20 = vmul.f32 %v274_v14, %v272_v11  ;;  %vm791_vm1 = vcmp.lt.f32.partialorder %v268_v9, %v278_v15  ;;  %v290_v22 = vsub.f32 %v269_v10, %v288_v16  ;;  %v312_v23 = vsub.f32 %v268_v9, %v310_v17  ;;  %p628_p5 = pnand %p627_p3, %p621_p0 }
  0x23   : > { %v281_v25 = vsel %vm791_vm1, 1, %v699_v24  ;;  %604 = vpow2.f32 %v207_v18  ;;  %v209_v9 = vmax.f32 %v784_v3, 0.0  ;;  %v356_v15 = vsub.f32 %v351_v54, %v355_v60 }
  0x24   : > { %v282_v27 = vrot.slane %v281_v25, 1  ;;  %v292_v28 = vrot.slane %v290_v22, 1  ;;  %v314_v29 = vrot.slane %v312_v23, 1  ;;  %v300_v30 = vrot.slane %v276_v20, 4 }
  0x25   : > { %606 = vpow2.f32 %v349_v31  ;;  %v818_v25 = vshrl.u32 %v239_v6, 7  ;;  %v232_v3 = vmul.f32 0.25, %v782_v1 }
  0x26   : > { %vm283_vm2 = vcmp.ne.s32.totalorder %v282_v27, 0  ;;  %v316_v32 = vmul.f32 %v314_v29, %v312_v23  ;;  %v294_v33 = vmul.f32 %v292_v28, %v290_v22  ;;  %v302_v37 = vadd.f32 %v300_v30, %v276_v20 }
  0x27   : > { %vm284_vm3 = vmand %vm791_vm1, %vm283_vm2  ;;  %v233_v22 = vsub.f32 1.0, %v782_v1  ;;  %v327_v23 = vrot.slane %v204_v8, 7  ;;  %v211_v27 = vsub.f32 %v209_v9, %v210_v12  ;;  %v367_v29 = vrot.slane %v204_v8, 1 }
  0x28   : > { %v530_v34 = vsel %vm284_vm3, 1.0, %v698_v7  ;;  %v318_v35 = vadd.f32 1e-14, %v316_v32  ;;  %v330_v30 = vrot.slane %v204_v8, 6  ;;  %vm393_vm8 = vcmp.eq.s32.totalorder %v818_v25, 0 }
  0x29   : > { %v296_v36 = vrot.slane %v530_v34, 6  ;;  %vm396_vm9 = vcmp.eq.s32.totalorder %v818_v25, 1  ;;  %vm400_vm10 = vcmp.eq.s32.totalorder %v818_v25, 2  ;;  %vm404_vm11 = vcmp.eq.s32.totalorder %v818_v25, 3 }
  0x2a   : > { %608 = vrcp.f32 %v318_v35  ;;  %vm408_vm12 = vcmp.eq.s32.totalorder %v818_v25, 4 }
  0x2b   : > { %v298_v38 = vmul.f32 %v296_v36, %v294_v33  ;;  %v241_v36 = vsub.s32 1, %v818_v25 }
  0x2d   : > { %v605_v39 = vpop.eup %604  ;;  %v303_v40 = vsub.f32 %v302_v37, %v298_v38 }
  0x2e   : > { %v212_v41 = vadd.f32 1.0, %v605_v39  ;;  %v215_v50 = vmul.f32 -0.5, %v605_v39  ;;  %v218_v5 = vand.u32 2147483647, %v605_v39 }
  0x2f   : > { %v304_v42 = vadd.f32 1e-14, %v303_v40  ;;  %v607_v43 = vpop.eup %606  ;;  %v317_v58 = vsub.f32 %v316_v32, %v303_v40 }
  0x30   : > { %v357_v44 = vadd.f32 1.0, %v607_v43  ;;  %v360_v47 = vmul.f32 -0.5, %v607_v43  ;;  %v363_v52 = vand.u32 2147483647, %v607_v43  ;;  %v216_v62 = vadd.f32 1.0, %v215_v50 }
  0x31   : > { %610 = vrcp.f32 %v304_v42  ;;  %vm812_vm5 = vcmp.lt.f32.partialorder %v218_v5, 0.0004427343 }
  0x32   : > { %612 = vrcp.f32 %v212_v41  ;;  %v361_v51 = vadd.f32 1.0, %v360_v47  ;;  %vm803_vm4 = vcmp.lt.f32.partialorder %v363_v52, 0.0004427343  ;;  %v217_v17 = vmul.f32 %v605_v39, %v216_v62 }
  0x33   : > { %614 = vlog2.f32 %v212_v41 }
  0x34   : > { %v609_v45 = vpop.eup %608  ;;  %616 = vlog2.f32 %v357_v44  ;;  %v362_v0 = vmul.f32 %v607_v43, %v361_v51  ;;  %v381_v51 = vsel %vm336_vm7, %v204_v8, 0.0 }
  0x35   : > { %v320_v46 = vmul.f32 %v609_v45, %v318_v35  ;;  %v234_v35 = vmul.f32 0.75, %v233_v22 }
  0x37   : > { %v321_v48 = vsub.f32 2.0, %v320_v46  ;;  %v242_v46 = vrot.slane %v204_v8, %v241_v36 }
  0x39   : > { %v322_v59 = vmul.f32 %v609_v45, %v321_v48 }
  0x3b   : > { %v611_v53 = vpop.eup %610  ;;  %v323_v14 = vmul.f32 %v322_v59, %v317_v58 }
  0x3c   : > { %v613_v55 = vpop.eup %612  ;;  %v306_v57 = vmul.f32 %v611_v53, %v304_v42  ;;  %v235_v42 = vadd.f32 %v234_v35, %v232_v3 }
  0x3d   : > { %v615_v61 = vpop.eup %614  ;;  %v224_v63 = vmul.f32 %v613_v55, %v212_v41 }
  0x3e   : > { %v617_v2 = vpop.eup %616  ;;  %v307_v4 = vsub.f32 2.0, %v306_v57  ;;  %v214_v16 = vmul.f32 0.6931472, %v615_v61 }
  0x3f   : > { %v225_v10 = vsub.f32 2.0, %v224_v63  ;;  %v359_v11 = vmul.f32 0.6931472, %v617_v2 }
  0x40   : > { %v308_v13 = vmul.f32 %v611_v53, %v307_v4  ;;  %v220_v31 = vsel %vm812_vm5, %v217_v17, %v214_v16 }
  0x41   : > { %v226_v18 = vmul.f32 %v613_v55, %v225_v10  ;;  %v365_v19 = vsel %vm803_vm4, %v362_v0, %v359_v11 }
  0x42   : > { %v309_v20 = vmul.f32 %v308_v13, %v298_v38  ;;  %v366_v28 = vadd.f32 %v365_v19, %v356_v15  ;;  %v221_v38 = vadd.f32 %v220_v31, %v211_v27 }
  0x43   : > { %v228_v24 = vmul.f32 %v605_v39, %v226_v18 }
  0x44   : > { %v324_v26 = vsub.f32 %v309_v20, %v323_v14  ;;  %v369_v40 = vmul.f32 %v367_v29, %v366_v28 }
  0x45   : > { %v229_v32 = vsel %vm227_vm6, %v226_v18, %v228_v24 }
  0x46   : > { %v325_v33 = vsub.f32 1.0, %v324_v26  ;;  %v230_v34 = vsub.f32 %v782_v1, %v229_v32  ;;  %v370_v47 = vmul.f32 %v369_v40, %v204_v8 }
  0x48   : > { %v329_v37 = vmul.f32 %v327_v23, %v325_v33  ;;  %v231_v39 = vand.u32 2147483647, %v230_v34  ;;  %v371_v1 = vsel %vm336_vm7, %v370_v47, 0.0 }
  0x4a   : > { %v332_v41 = vmul.f32 %v330_v30, %v329_v37  ;;  %v236_v43 = vmul.f32 %v231_v39, %v231_v39 }
  0x4c   : > { %v334_v44 = vrot.slane %v332_v41, 2  ;;  %v237_v45 = vmul.f32 %v236_v43, %v221_v38 }
  0x4e   : > { %v337_v48 = vsel %vm336_vm7, %v334_v44, 0.0  ;;  %v238_v49 = vmul.f32 %v237_v45, %v235_v42 }
  0x4f   : > { %338 = vadd.xlane.f32.xlu1 %v337_v48 }
  0x50   : > { %v243_v50 = vmul.f32 %v242_v46, %v238_v49 }
  0x52   : > { %244 = vadd.xlane.f32.xlu0 %v243_v50 }
  0x53   : > { %372 = vadd.xlane.f32.xlu1 %v371_v1 }
  0x56   : > { %382 = vadd.xlane.f32.xlu0 %v381_v51 }
  0xac   : > { %v257_v52 = vpop.xlane.xlu0 %256 }
  0xad   : > { %v258_v53 = vrot.slane %v257_v52, 4 }
  0xaf   : > { %v259_v54 = vadd.f32 %v258_v53, %v257_v52 }
  0xb1   : > { %v260_v57 = vrot.slane %v259_v54, 2 }
  0xb3   : > { %v261_v5 = vadd.f32 %v260_v57, %v259_v54 }
  0xb5   : > { %v262_v12 = vrot.slane %v261_v5, 1 }
  0xb7   : > { %v263_v21 = vadd.f32 %v262_v12, %v261_v5 }
  0xdc   : > { %v339_v55 = vpop.xlane.xlu1 %338 }
  0xdd   : > { %v340_v56 = vrot.slane %v339_v55, 4 }
  0xdf   : > { %v341_v58 = vadd.f32 %v340_v56, %v339_v55  ;;  %v245_v59 = vpop.xlane.xlu0 %244 }
  0xe0   : > { %v246_v60 = vrot.slane %v245_v59, 4  ;;  %v373_v61 = vpop.xlane.xlu1 %372 }
  0xe1   : > { %v342_v62 = vrot.slane %v341_v58, 2  ;;  %v374_v63 = vrot.slane %v373_v61, 4 }
  0xe2   : > { %v247_v0 = vadd.f32 %v246_v60, %v245_v59 }
  0xe3   : > { %v375_v2 = vadd.f32 %v374_v63, %v373_v61  ;;  %v383_v4 = vpop.xlane.xlu0 %382  ;;  %v343_v6 = vadd.f32 %v342_v62, %v341_v58 }
  0xe4   : > { %v248_v7 = vrot.slane %v247_v0, 2  ;;  %v384_v8 = vrot.slane %v383_v4, 4 }
  0xe5   : > { %v376_v9 = vrot.slane %v375_v2, 2  ;;  %v344_v13 = vrot.slane %v343_v6, 1 }
  0xe6   : > { %v385_v10 = vadd.f32 %v384_v8, %v383_v4  ;;  %v249_v11 = vadd.f32 %v248_v7, %v247_v0 }
  0xe7   : > { %v377_v14 = vadd.f32 %v376_v9, %v375_v2  ;;  %v345_v20 = vadd.f32 %v344_v13, %v343_v6 }
  0xe8   : > { %v386_v15 = vrot.slane %v385_v10, 2  ;;  %v250_v16 = vrot.slane %v249_v11, 1 }
  0xe9   : > { %v378_v17 = vrot.slane %v377_v14, 1 }
  0xea   : > { %v387_v18 = vadd.f32 %v386_v15, %v385_v10  ;;  %v251_v19 = vadd.f32 %v250_v16, %v249_v11 }
  0xeb   : > { %v379_v22 = vadd.f32 %v378_v17, %v377_v14 }
  0xec   : > { %537 = vpush %v251_v19  ;;  %v388_v23 = vrot.slane %v387_v18, 1 }
  0xed   : > { %539 = vpush %v263_v21 }
  0xee   : > { %541 = vpush %v345_v20  ;;  %v389_v24 = vadd.f32 %v388_v23, %v387_v18 }
  0xef   : > { %543 = vpush %v379_v22 }
  0xf0   : > { %545 = vpush %v389_v24 }
 0x11d   : > { %s538_s5 = spop %537 }
 0x11e   : > { %v394_v26 = vstv %s538_s5  ;;  %s540_s6 = spop %539 }
 0x11f   : > { %v395_v27 = vsel %vm393_vm8, %v394_v26, 0.0  ;;  %s542_s7 = spop %541  ;;  %v409_v34 = vstv %s540_s6 }
 0x120   : > { %v397_v28 = vstv %s542_s7  ;;  %s544_s15 = spop %543  ;;  %v410_v37 = vsel %vm408_vm12, %v409_v34, 0.0 }
 0x121   : > { %v398_v29 = vsel %vm396_vm9, %v397_v28, 0.0  ;;  %v401_v30 = vstv %s544_s15  ;;  %s546_s16 = spop %545 }
 0x122   : > { %v399_v31 = vadd.f32 %v398_v29, %v395_v27  ;;  %v402_v32 = vsel %vm400_vm10, %v401_v30, 0.0  ;;  %v405_v33 = vstv %s546_s16 }
 0x123   : > { %v406_v35 = vsel %vm404_vm11, %v405_v33, 0.0 }
 0x124   : > { %v403_v3 = vadd.f32 %v402_v32, %v399_v31 }
 0x126   : > { %v407_v36 = vadd.f32 %v406_v35, %v403_v3 }
 0x128   : > { %v411_v38 = vadd.f32 %v410_v37, %v407_v36 }
 0x12a   : > { %412 = vst [vmem:[%s181_s20] sm:$0xff] %v411_v38 }
 0x12b   : > { %631 = shalt.err (!%p628_p5)
}
 0x12c   : > { %s632_s3 = scalar_lea.hbm %s837_s26, 128  ;;  %s636_s6 = scalar_lea.hbm %s888_s2, 256 }
 0x12d   : > { %p633_p6 = scmp.ne.s32.totalorder %s837_s26, %s632_s3  ;;  %p637_p10 = scmp.lt.u32.totalorder %s837_s26, %s888_s2 }
 0x12e   : > { %p638_p11 = scmp.lt.u32.totalorder %s636_s6, %s632_s3  ;;  %p640_p13 = scmp.lt.u32.totalorder %s632_s3, %s837_s26 }
 0x12f   : > { %p634_p7 = pnand %p633_p6, %p756_p4 }
 0x130   : > { %p639_p12 = por %p638_p11, %p637_p10 }
 0x131   : > { %p635_p9 = pneg %p634_p7 }
 0x132   : > { %p641_p0 = por %p640_p13, %p639_p12 }
 0x134   : > { %p642_p1 = pnand %p641_p0, %p635_p9 }
 0x136   : > { %645 = shalt.err (!%p642_p1)
}
 0x137   : > { %547 = dma.vmem_to_hbm [thread:$0]  (%p756_p4), %s839_s23, 128, %s837_s26, %s414_s27  }
 0x138 PF: > { %p553_p2 = scmp.ge.s32.totalorder %s696_s14, 2  ;;  %s440_s15 = sand.u32 1, %s676_s9  }
 0x139   : > { %s441_s16 = scalar_lea.sflag [#allocation3], %s440_s15 }
 0x13a   : > { %p550_p3 = pnand %p553_p2, %p763_p8 }
 0x13c   : > { %671 = dma.done.wait (!%p550_p3), %s441_s16, 128  }
 0x13d   : > { %673 = vsyncadd (!%p550_p3), %s441_s16, 4294967168  ;;  %s15_s14 = sadd.s32 1, %s696_s14   ;;  %s897_s9 = smov %s680_s10 }
 0x13e   : > { %p12_p5 = scmp.ge.s32.totalorder %s15_s14, 4   ;;  %s898_s10 = smov %s684_s11 }
 0x13f   : > { %s899_s11 = smov %s769_s22  ;;  %s900_s12 = smov %s692_s13 }
 0x140   : > { %s901_s13 = smov %s903_s17  ;;  %14 = sbr.rel (!%p12_p5) target bundleno = 4 (0x4), region = 66 }
 0x147   :  { %446 = vsyncpa [#allocation3], 1 }
 0x148   :  { %448 = vsyncpa [#allocation3 + $0x1], 1 }

</bundles_post_ra>
